<compile_context>
chip_gen: v7x
topology: tpu7x:2x2x1
jax: 0.10.0
libtpu: 0.0.40
codegen_flags: <defaults>
</compile_context>

<pallas_src>
import functools

import jax
import jax.numpy as jnp
from jax import lax
from jax.experimental import pallas as pl
from jax.experimental.pallas import tpu as pltpu

ANNUALIZATION_FACTOR = 252
LOOKBACK_PERIOD = 252   # unused in forward (kept for parity with module __init__)
EPS = 1e-6
_LANE = 128
_NEG_LARGE = -3.0e38    # finite "-inf" identity for the max scan (f32-safe)


def _round_up(x, m):
    return ((x + m - 1) // m) * m


def _cdiv(a, b):
    return (a + b - 1) // b


def _pow_int(x, n):
    """x ** n for a static positive int n via binary exponentiation (narrow-column VPU muls)."""
    acc = None
    base = x
    while n:
        if n & 1:
            acc = base if acc is None else acc * base
        n >>= 1
        if n:
            base = base * base
    return acc


def _calmar_kernel(r_ref, tri_ref, o_ref, *, seq_len):
    # TODO(synk): the log-space formulation assumes 1 + r > 0 (returns > -100%);
    # the PyTorch reference also degenerates (Inf/NaN drawdowns) outside that regime.
    r = r_ref[...].astype(jnp.float32)                      # (TB, S_pad), cast in VMEM
    tb, s_pad = r.shape

    # ---- annualized return: (1 + mean)^A - 1 on a narrow (TB, 1) column -----
    mean_ret = jnp.sum(r, axis=1, keepdims=True) * (1.0 / seq_len)   # padded lanes add 0
    ann_ret = _pow_int(1.0 + mean_ret, ANNUALIZATION_FACTOR) - 1.0

    # ---- cumulative log-return via an MXU triangular-matmul cumsum ----------
    l = jnp.log(1.0 + r)                                     # EUP slot; 0 on padded lanes/rows
    # bf16 hi/lo split: tri is exact in bf16, so two bf16 MXU passes accumulated
    # in f32 keep full f32 accuracy without relying on f32-matmul precision modes.
    l_hi = l.astype(jnp.bfloat16)
    l_lo = (l - l_hi.astype(jnp.float32)).astype(jnp.bfloat16)
    tri = tri_ref[...]                                       # (S_pad, S_pad) bf16, tri[j,t] = j <= t
    cum_log = (jnp.dot(l_hi, tri, preferred_element_type=jnp.float32) +
               jnp.dot(l_lo, tri, preferred_element_type=jnp.float32))

    # ---- running max of cum_log: log-depth Hillis-Steele max scan -----------
    lane = lax.broadcasted_iota(jnp.int32, (tb, s_pad), 1)   # hoisted once
    run_max = cum_log
    d = 1
    while d < s_pad:
        shifted = pltpu.roll(run_max, shift=d, axis=1)       # XLU slot
        run_max = jnp.maximum(run_max, jnp.where(lane >= d, shifted, _NEG_LARGE))
        d *= 2

    # ---- max drawdown & calmar, still in log space --------------------------
    # max_t (run_max - cum) / run_max == 1 - exp(min_t (cum_log - run_max_log)),
    # so the full-tile divide disappears; only a (TB,1) exp + divide remain.
    min_diff = jnp.min(cum_log - run_max, axis=1, keepdims=True)     # (TB, 1)
    max_dd = 1.0 - jnp.exp(min_diff) + EPS
    calmar = ann_ret / max_dd                                        # (TB, 1); 0 for padded rows

    # Per-block partial sum written as a lane-dense row.
    blk_sum = jnp.sum(calmar, axis=0, keepdims=True)                 # (1, 1)
    o_ref[...] = jnp.broadcast_to(blk_sum.reshape(1, 1, 1), (1, 1, _LANE))


def calmar_ratio_loss(returns, *, tile_b=512):
    """Negative Calmar ratio (scalar), batch-tiled Pallas TPU kernel."""
    B, S = returns.shape
    s_pad = _round_up(max(S, _LANE), _LANE)
    b8 = _round_up(max(B, 1), 8)
    itemsize = jnp.dtype(returns.dtype).itemsize

    # Block geometry: largest batch tile under a conservative VMEM budget
    # (double-buffered input + resident bf16 triangular matrix + f32 temporaries
    # must stay well below the 32 MiB scoped-VMEM default; v7x only has 64 MiB
    # physical VMEM, so we do not rely on anything beyond the default limit).
    tile = min(max(8, _round_up(int(tile_b), 8)), b8)
    budget = 24 * 1024 * 1024

    def _footprint(t):
        return (2 * t * s_pad * itemsize          # double-buffered input block
                + 2 * s_pad * s_pad * 2           # bf16 triangular matrix (2 bufs)
                + 8 * t * s_pad * 4)              # f32 temporaries (l, cum_log, scan, ...)

    while tile > 8 and _footprint(tile) > budget:
        tile -= 8
    # TODO(synk): for very long sequences (s_pad >~ 1536) the (s_pad, s_pad)
    # triangular matrix alone dominates VMEM; chunk the cumsum matmul along the
    # sequence if such shapes are ever needed (module default lookback is 252).

    n_blk = _cdiv(b8, tile)
    if b8 > 8 and n_blk % 2 == 1:
        n_blk += 1                                # even block count -> both v7x TCs get work
    tile = _round_up(_cdiv(b8, n_blk), 8)
    b_pad = tile * n_blk

    r = returns                                   # keep caller dtype; kernel casts in VMEM
    if (b_pad, s_pad) != (B, S):
        r = jnp.pad(r, ((0, b_pad - B), (0, s_pad - S)))     # zero pad is exactly neutral

    idx = jnp.arange(s_pad, dtype=jnp.int32)
    tri = (idx[:, None] <= idx[None, :]).astype(jnp.bfloat16)   # exact 0/1 in bf16

    partial = pl.pallas_call(
        functools.partial(_calmar_kernel, seq_len=S),
        out_shape=jax.ShapeDtypeStruct((n_blk, 1, _LANE), jnp.float32),
        grid=(n_blk,),
        in_specs=[
            pl.BlockSpec((tile, s_pad), lambda i: (i, 0)),
            pl.BlockSpec((s_pad, s_pad), lambda i: (0, 0)),   # same block every step -> loaded once
        ],
        out_specs=pl.BlockSpec((1, 1, _LANE), lambda i: (i, 0, 0)),
        compiler_params=pltpu.CompilerParams(
            dimension_semantics=("parallel",)),
    )(r, tri)

    return -jnp.sum(partial[:, 0, 0]) / B


def calmar_ratio_loss_ref(returns):
    """Pure-JAX reference mirroring the PyTorch forward exactly."""
    returns = returns.astype(jnp.float32)
    mean_return = jnp.mean(returns, axis=1)
    annualized = (1.0 + mean_return) ** ANNUALIZATION_FACTOR - 1.0
    cum = jnp.cumprod(1.0 + returns, axis=1)
    run_max = lax.cummax(cum, axis=1)
    drawdowns = (run_max - cum) / run_max
    max_dd = jnp.max(drawdowns, axis=1) + EPS
    return -jnp.mean(annualized / max_dd)


if __name__ == "__main__":
    k1, k2 = jax.random.split(jax.random.PRNGKey(0))

    # Small shape consistent with the module: batch=4, seq=16 (daily-return scale).
    returns = jax.random.normal(k1, (4, 16), dtype=jnp.float32) * 0.01
    loss = calmar_ratio_loss(returns)
    jax.block_until_ready(loss)
    ref = calmar_ratio_loss_ref(returns)
    assert jnp.allclose(loss, ref, rtol=1e-3, atol=1e-3), (loss, ref)

    # Multi-block path: grid > 1 plus batch- and seq-padding exercised.
    returns2 = jax.random.normal(k2, (20, 252), dtype=jnp.float32) * 0.01
    loss2 = calmar_ratio_loss(returns2, tile_b=8)
    jax.block_until_ready(loss2)
    ref2 = calmar_ratio_loss_ref(returns2)
    assert jnp.allclose(loss2, ref2, rtol=1e-3, atol=1e-3), (loss2, ref2)

    print("KERNEL_OK")
</pallas_src>

<mosaic_0001>
module attributes {stable_mosaic.version = 11 : i64} {
  func.func @_calmar_kernel(%arg0: i32, %arg1: memref<8x128xf32, #tpu.memory_space<vmem>>, %arg2: memref<128x128xbf16, #tpu.memory_space<vmem>>, %arg3: memref<1x1x128xf32, #tpu.memory_space<vmem>>) attributes {dimension_semantics = [#tpu.dimension_semantics<parallel>], iteration_bounds = array<i64: 1>, scalar_prefetch = 0 : i64, scratch_operands = 0 : i64, tpu.core_type = #tpu.core_type<tc>, window_params = [{transform_indices = @transform_0, window_bounds = array<i64: 8, 128>}, {pipeline_mode = #tpu.pipeline_mode<synchronous>, transform_indices = @transform_1, window_bounds = array<i64: 128, 128>}, {transform_indices = @transform_2, window_bounds = array<i64: 1, 1, 128>}]} {
    %c0 = arith.constant 0 : index
    %c0_0 = arith.constant 0 : index
    %0 = vector.load %arg1[%c0, %c0_0] : memref<8x128xf32, #tpu.memory_space<vmem>>, vector<8x128xf32>
    %cst = arith.constant dense<0.000000e+00> : vector<8xf32>
    %1 = vector.multi_reduction <add>, %0, %cst [1] : vector<8x128xf32> to vector<8xf32>
    %2 = vector.shape_cast %1 : vector<8xf32> to vector<8x1xf32>
    %cst_1 = arith.constant 6.250000e-02 : f32
    %3 = vector.broadcast %cst_1 : f32 to vector<8x1xf32>
    %4 = arith.mulf %2, %3 : vector<8x1xf32>
    %cst_2 = arith.constant 1.000000e+00 : f32
    %5 = vector.broadcast %cst_2 : f32 to vector<8x1xf32>
    %6 = arith.addf %5, %4 : vector<8x1xf32>
    %7 = arith.mulf %6, %6 : vector<8x1xf32>
    %8 = arith.mulf %7, %7 : vector<8x1xf32>
    %9 = arith.mulf %8, %8 : vector<8x1xf32>
    %10 = arith.mulf %8, %9 : vector<8x1xf32>
    %11 = arith.mulf %9, %9 : vector<8x1xf32>
    %12 = arith.mulf %10, %11 : vector<8x1xf32>
    %13 = arith.mulf %11, %11 : vector<8x1xf32>
    %14 = arith.mulf %12, %13 : vector<8x1xf32>
    %15 = arith.mulf %13, %13 : vector<8x1xf32>
    %16 = arith.mulf %14, %15 : vector<8x1xf32>
    %17 = arith.mulf %15, %15 : vector<8x1xf32>
    %18 = arith.mulf %16, %17 : vector<8x1xf32>
    %cst_3 = arith.constant 1.000000e+00 : f32
    %19 = vector.broadcast %cst_3 : f32 to vector<8x1xf32>
    %20 = arith.subf %18, %19 : vector<8x1xf32>
    %cst_4 = arith.constant 1.000000e+00 : f32
    %21 = vector.broadcast %cst_4 : f32 to vector<8x128xf32>
    %22 = arith.addf %21, %0 : vector<8x128xf32>
    %23 = math.log %22 : vector<8x128xf32>
    %24 = arith.truncf %23 : vector<8x128xf32> to vector<8x128xbf16>
    %25 = arith.extf %24 : vector<8x128xbf16> to vector<8x128xf32>
    %26 = arith.subf %23, %25 : vector<8x128xf32>
    %27 = arith.truncf %26 : vector<8x128xf32> to vector<8x128xbf16>
    %c0_5 = arith.constant 0 : index
    %c0_6 = arith.constant 0 : index
    %28 = vector.load %arg2[%c0_5, %c0_6] : memref<128x128xbf16, #tpu.memory_space<vmem>>, vector<128x128xbf16>
    %cst_7 = arith.constant dense<0.000000e+00> : vector<8x128xf32>
    %29 = tpu.matmul %24, %28, %cst_7 {dimension_numbers = #tpu.dot_dimension_numbers<[1], [0], [0], [1], [0, 0, 1, 1], [], []>} : vector<8x128xbf16>, vector<128x128xbf16>, vector<8x128xf32> -> vector<8x128xf32>
    %cst_8 = arith.constant dense<0.000000e+00> : vector<8x128xf32>
    %30 = tpu.matmul %27, %28, %cst_8 {dimension_numbers = #tpu.dot_dimension_numbers<[1], [0], [0], [1], [0, 0, 1, 1], [], []>} : vector<8x128xbf16>, vector<128x128xbf16>, vector<8x128xf32> -> vector<8x128xf32>
    %31 = arith.addf %29, %30 : vector<8x128xf32>
    %32 = tpu.iota {dimensions = array<i32: 1>} : vector<8x128xi32>
    %c1_i32 = arith.constant 1 : i32
    %33 = tpu.dynamic_rotate %31 by %c1_i32 dim 1 : vector<8x128xf32>, i32 -> vector<8x128xf32>
    %c1_i32_9 = arith.constant 1 : i32
    %34 = vector.broadcast %c1_i32_9 : i32 to vector<8x128xi32>
    %35 = arith.cmpi sge, %32, %34 : vector<8x128xi32>
    %cst_10 = arith.constant -3.000000e+38 : f32
    %36 = vector.broadcast %cst_10 : f32 to vector<8x128xf32>
    %37 = arith.select %35, %33, %36 : vector<8x128xi1>, vector<8x128xf32>
    %38 = arith.maximumf %31, %37 : vector<8x128xf32>
    %c2_i32 = arith.constant 2 : i32
    %39 = tpu.dynamic_rotate %38 by %c2_i32 dim 1 : vector<8x128xf32>, i32 -> vector<8x128xf32>
    %c2_i32_11 = arith.constant 2 : i32
    %40 = vector.broadcast %c2_i32_11 : i32 to vector<8x128xi32>
    %41 = arith.cmpi sge, %32, %40 : vector<8x128xi32>
    %cst_12 = arith.constant -3.000000e+38 : f32
    %42 = vector.broadcast %cst_12 : f32 to vector<8x128xf32>
    %43 = arith.select %41, %39, %42 : vector<8x128xi1>, vector<8x128xf32>
    %44 = arith.maximumf %38, %43 : vector<8x128xf32>
    %c4_i32 = arith.constant 4 : i32
    %45 = tpu.dynamic_rotate %44 by %c4_i32 dim 1 : vector<8x128xf32>, i32 -> vector<8x128xf32>
    %c4_i32_13 = arith.constant 4 : i32
    %46 = vector.broadcast %c4_i32_13 : i32 to vector<8x128xi32>
    %47 = arith.cmpi sge, %32, %46 : vector<8x128xi32>
    %cst_14 = arith.constant -3.000000e+38 : f32
    %48 = vector.broadcast %cst_14 : f32 to vector<8x128xf32>
    %49 = arith.select %47, %45, %48 : vector<8x128xi1>, vector<8x128xf32>
    %50 = arith.maximumf %44, %49 : vector<8x128xf32>
    %c8_i32 = arith.constant 8 : i32
    %51 = tpu.dynamic_rotate %50 by %c8_i32 dim 1 : vector<8x128xf32>, i32 -> vector<8x128xf32>
    %c8_i32_15 = arith.constant 8 : i32
    %52 = vector.broadcast %c8_i32_15 : i32 to vector<8x128xi32>
    %53 = arith.cmpi sge, %32, %52 : vector<8x128xi32>
    %cst_16 = arith.constant -3.000000e+38 : f32
    %54 = vector.broadcast %cst_16 : f32 to vector<8x128xf32>
    %55 = arith.select %53, %51, %54 : vector<8x128xi1>, vector<8x128xf32>
    %56 = arith.maximumf %50, %55 : vector<8x128xf32>
    %c16_i32 = arith.constant 16 : i32
    %57 = tpu.dynamic_rotate %56 by %c16_i32 dim 1 : vector<8x128xf32>, i32 -> vector<8x128xf32>
    %c16_i32_17 = arith.constant 16 : i32
    %58 = vector.broadcast %c16_i32_17 : i32 to vector<8x128xi32>
    %59 = arith.cmpi sge, %32, %58 : vector<8x128xi32>
    %cst_18 = arith.constant -3.000000e+38 : f32
    %60 = vector.broadcast %cst_18 : f32 to vector<8x128xf32>
    %61 = arith.select %59, %57, %60 : vector<8x128xi1>, vector<8x128xf32>
    %62 = arith.maximumf %56, %61 : vector<8x128xf32>
    %c32_i32 = arith.constant 32 : i32
    %63 = tpu.dynamic_rotate %62 by %c32_i32 dim 1 : vector<8x128xf32>, i32 -> vector<8x128xf32>
    %c32_i32_19 = arith.constant 32 : i32
    %64 = vector.broadcast %c32_i32_19 : i32 to vector<8x128xi32>
    %65 = arith.cmpi sge, %32, %64 : vector<8x128xi32>
    %cst_20 = arith.constant -3.000000e+38 : f32
    %66 = vector.broadcast %cst_20 : f32 to vector<8x128xf32>
    %67 = arith.select %65, %63, %66 : vector<8x128xi1>, vector<8x128xf32>
    %68 = arith.maximumf %62, %67 : vector<8x128xf32>
    %c64_i32 = arith.constant 64 : i32
    %69 = tpu.dynamic_rotate %68 by %c64_i32 dim 1 : vector<8x128xf32>, i32 -> vector<8x128xf32>
    %c64_i32_21 = arith.constant 64 : i32
    %70 = vector.broadcast %c64_i32_21 : i32 to vector<8x128xi32>
    %71 = arith.cmpi sge, %32, %70 : vector<8x128xi32>
    %cst_22 = arith.constant -3.000000e+38 : f32
    %72 = vector.broadcast %cst_22 : f32 to vector<8x128xf32>
    %73 = arith.select %71, %69, %72 : vector<8x128xi1>, vector<8x128xf32>
    %74 = arith.maximumf %68, %73 : vector<8x128xf32>
    %75 = arith.subf %31, %74 : vector<8x128xf32>
    %cst_23 = arith.constant dense<0x7F800000> : vector<8xf32>
    %76 = vector.multi_reduction <minimumf>, %75, %cst_23 [1] : vector<8x128xf32> to vector<8xf32>
    %77 = vector.shape_cast %76 : vector<8xf32> to vector<8x1xf32>
    %78 = math.exp %77 : vector<8x1xf32>
    %cst_24 = arith.constant 1.000000e+00 : f32
    %79 = vector.broadcast %cst_24 : f32 to vector<8x1xf32>
    %80 = arith.subf %79, %78 : vector<8x1xf32>
    %cst_25 = arith.constant 9.99999997E-7 : f32
    %81 = vector.broadcast %cst_25 : f32 to vector<8x1xf32>
    %82 = arith.addf %80, %81 : vector<8x1xf32>
    %83 = arith.divf %20, %82 : vector<8x1xf32>
    %cst_26 = arith.constant dense<0.000000e+00> : vector<1xf32>
    %84 = vector.multi_reduction <add>, %83, %cst_26 [0] : vector<8x1xf32> to vector<1xf32>
    %85 = vector.shape_cast %84 : vector<1xf32> to vector<1x1xf32>
    %86 = vector.shape_cast %85 : vector<1x1xf32> to vector<1x1x1xf32>
    %87 = vector.shape_cast %86 : vector<1x1x1xf32> to vector<1x1x1xf32>
    %88 = vector.broadcast %87 : vector<1x1x1xf32> to vector<1x1x128xf32>
    %c0_27 = arith.constant 0 : index
    %c0_28 = arith.constant 0 : index
    %c0_29 = arith.constant 0 : index
    %89 = vector.load %arg3[%c0_27, %c0_28, %c0_29] : memref<1x1x128xf32, #tpu.memory_space<vmem>>, vector<1x1x128xf32>
    tpu.vector_store %arg3[%c0_27, %c0_28, %c0_29], %88 {strides = array<i32>} : memref<1x1x128xf32, #tpu.memory_space<vmem>>, vector<1x1x128xf32>,
    return
  }
  func.func @transform_0(%arg0: i32) -> (i32, i32) {
    %c0_i32 = arith.constant 0 : i32
    %c0_i32_0 = arith.constant 0 : i32
    return %arg0, %c0_i32 : i32, i32
  }
  func.func @transform_1(%arg0: i32) -> (i32, i32) {
    %c0_i32 = arith.constant 0 : i32
    %c0_i32_0 = arith.constant 0 : i32
    %c0_i32_1 = arith.constant 0 : i32
    return %c0_i32, %c0_i32_0 : i32, i32
  }
  func.func @transform_2(%arg0: i32) -> (i32, i32, i32) {
    %c0_i32 = arith.constant 0 : i32
    %c0_i32_0 = arith.constant 0 : i32
    %c0_i32_1 = arith.constant 0 : i32
    return %arg0, %c0_i32, %c0_i32_0 : i32, i32, i32
  }
}

</mosaic_0001>

<bundles_post_ra>
// kernel: tpu_custom_call.1
= control target key start
LH: loop header
LB: loop body
LE: loop exit
PB: predicated region body
PF: predicated region fallthrough
CT: control target
= control target key end

     0   :  { %7 = vsyncpa [#allocation3], 0  ;;  %s522_s0 = inlined_call_operand.hbm [shape: f32[8,128], index: 0, kind: input, shape index: {}]   ;;  %s523_s1 = inlined_call_operand.hbm [shape: bf16[128,128], index: 1, kind: input, shape index: {}]   ;;  %s524_s2 = inlined_call_operand.hbm [shape: f32[1,1,128], index: 2, kind: output, shape index: {}]  }
   0x1   :  { %8 = vsyncpa [#allocation6], 0 }
   0x2   :  { %9 = vsyncpa [#allocation4], 0  ;;  %s443_s9 = smov [#allocation2]   ;;  %s444_s11 = smov [#allocation5]  }
   0x3   :  { %s16_s10 = sshll.u32 %s443_s9, 4  ;;  %s25_s12 = sshll.u32 %s444_s11, 4  ;;  %s17_s10 = int_to_ptr.vmem [resolvable:$true] %s16_s10  ;;  %s470_s12 = int_to_ptr.vmem [resolvable:$true] %s25_s12 }
   0x4   :  { %s371_s15 = scalar_lea.hbm %s522_s0, 128 }
   0x5   :  { %p372_p0 = scmp.ne.s32.totalorder %s522_s0, %s371_s15  ;;  %p375_p1 = scmp.lt.u32.totalorder %s371_s15, %s522_s0 }
   0x7   :  { %p377_p2 = pnand %p375_p1, %p372_p0 }
   0x9   :  { %380 = shalt.err (!%p377_p2)
}
   0xa   :  { %s381_s20 = scalar_lea.vmem %s17_s10, 128  ;;  %p386_p4 = scmp.lt.s32.totalorder %s17_s10, %s17_s10 }
   0xb   :  { %p382_p3 = scmp.ne.s32.totalorder %s17_s10, %s381_s20  ;;  %p387_p5 = scmp.lt.s32.totalorder %s381_s20, %s381_s20 }
   0xd   :  { %p388_p6 = por %p387_p5, %p386_p4 }
   0xf   :  { %p389_p7 = pnand %p388_p6, %p382_p3 }
  0x11   :  { %392 = shalt.err (!%p389_p7)
}
  0x12   :  { %19 = dma.hbm_to_vmem [thread:$0]  %s522_s0, 128, %s17_s10, [#allocation3]  }
  0x13   :  { %s393_s25 = scalar_lea.hbm %s523_s1, 1024 }
  0x14   :  { %p394_p8 = scmp.ne.s32.totalorder %s523_s1, %s393_s25  ;;  %p397_p9 = scmp.lt.u32.totalorder %s393_s25, %s523_s1 }
  0x16   :  { %p399_p10 = pnand %p397_p9, %p394_p8 }
  0x18   :  { %402 = shalt.err (!%p399_p10)
}
  0x19   :  { %s403_s30 = scalar_lea.vmem %s470_s12, 1024  ;;  %p408_p12 = scmp.lt.s32.totalorder %s470_s12, %s470_s12 }
  0x1a   :  { %p404_p11 = scmp.ne.s32.totalorder %s470_s12, %s403_s30  ;;  %p409_p13 = scmp.lt.s32.totalorder %s403_s30, %s403_s30 }
  0x1c   :  { %p410_p0 = por %p409_p13, %p408_p12 }
  0x1e   :  { %p411_p1 = pnand %p410_p0, %p404_p11 }
  0x20   :  { %414 = shalt.err (!%p411_p1)
}
  0x21   :  { %s445_s0 = smov 64   ;;  %s446_s3 = smov 4  }
  0x22   :  { %31 = dma.hbm_to_vmem [thread:$0]  %s523_s1, 1024, %s470_s12, [#allocation6], %s445_s0, %s445_s0, %s446_s3  }
  0x23   :  { %437 = dma.done.wait [#allocation3], 128  }
  0x24   :  { %438 = vsyncadd [#allocation3], 4294967168 }
  0x25   :  { %439 = dma.done.wait [#allocation6], 1024  }
  0x26   :  { %440 = vsyncadd [#allocation6], 4294966272  ;;  %v447_v0 = vmov 0.0   ;;  %vm448_vm0 = vmmov 0   ;;  %v357_v1 = vld [vmem:[#allocation5] sm:$0xff]   ;;  %v358_v2 = vld [vmem:[#allocation5 + $0x8] sm:$0xff]   ;;  %v208_v26 = vlaneseq }
  0x27   :  { %304 = vmatprep.subr.bf16.mxu1 %v447_v0  ;;  %324 = vmatprep.subr.bf16.mxu0 %v447_v0  ;;  %v359_v3 = vld [vmem:[#allocation5 + $0x10] sm:$0xff]   ;;  %v504_v4 = vld [vmem:[#allocation2] sm:$0xff]  ;;  %v361_v7 = vld [vmem:[#allocation5 + $0x20] sm:$0xff]   ;;  %s449_s1 = smov 1   ;;  %s450_s6 = smov 2  }
  0x28   :  { %320 = vmatprep.mubr.msk.bf16.mxu1 %vm448_vm0, %v447_v0  ;;  %340 = vmatprep.mubr.msk.bf16.mxu0 %vm448_vm0, %v447_v0  ;;  %v57_v5 = vadd.f32 1.0, %v504_v4  ;;  %v360_v6 = vld [vmem:[#allocation5 + $0x18] sm:$0xff]   ;;  %v362_v8 = vld [vmem:[#allocation5 + $0x28] sm:$0xff]   ;;  %v363_v10 = vld [vmem:[#allocation5 + $0x30] sm:$0xff]   ;;  %v209_v27 = vand.u32 127, %v208_v26  ;;  %s451_s7 = smov 8  }
  0x29   :  { %305 = vmatpush3.bf16.msra.mxu1 %v357_v1  ;;  %325 = vmatpush3.bf16.msra.mxu0 %v357_v1  ;;  %v364_v13 = vld [vmem:[#allocation5 + $0x38] sm:$0xff]   ;;  %s452_s8 = smov 16   ;;  %s453_s9 = smov 32  }
  0x2a   :  { %306 = vmatprep.subr.bf16.mxu1 %v447_v0  ;;  %326 = vmatprep.subr.bf16.mxu0 %v447_v0  ;;  %365 = vlog2.f32 %v57_v5  ;;  %vm212_vm1 = vcmp.ge.s32.totalorder %v209_v27, 1  ;;  %vm217_vm2 = vcmp.ge.s32.totalorder %v209_v27, 2  ;;  %vm222_vm3 = vcmp.ge.s32.totalorder %v209_v27, 4  ;;  %s454_s10 = smov [#allocation7]  }
  0x2b   :  { %vm227_vm4 = vcmp.ge.s32.totalorder %v209_v27, 8  ;;  %vm232_vm5 = vcmp.ge.s32.totalorder %v209_v27, 16  ;;  %vm237_vm6 = vcmp.ge.s32.totalorder %v209_v27, 32  ;;  %vm242_vm7 = vcmp.ge.s32.totalorder %v209_v27, 64  ;;  %s267_s11 = sshll.u32 %s454_s10, 4  ;;  %s268_s11 = int_to_ptr.vmem [resolvable:$true] %s267_s11 }
  0x2c   :  { %s415_s12 = scalar_lea.vmem %s268_s11, 16  ;;  %s419_s13 = scalar_lea.vmem %s268_s11, 32 }
  0x2d   :  { %307 = vmatpush3.bf16.msra.mxu1 %v358_v2  ;;  %327 = vmatpush3.bf16.msra.mxu0 %v358_v2  ;;  %p416_p2 = scmp.ne.s32.totalorder %s268_s11, %s415_s12  ;;  %p420_p3 = scmp.lt.s32.totalorder %s268_s11, %s268_s11 }
  0x2e   :  { %308 = vmatprep.subr.bf16.mxu1 %v447_v0  ;;  %328 = vmatprep.subr.bf16.mxu0 %v447_v0  ;;  %p421_p4 = scmp.lt.s32.totalorder %s419_s13, %s415_s12 }
  0x30   :  { %p422_p5 = por %p421_p4, %p420_p3 }
  0x31   :  { %309 = vmatpush3.bf16.msra.mxu1 %v359_v3  ;;  %329 = vmatpush3.bf16.msra.mxu0 %v359_v3 }
  0x32   :  { %310 = vmatprep.subr.bf16.mxu1 %v447_v0  ;;  %330 = vmatprep.subr.bf16.mxu0 %v447_v0  ;;  %p423_p6 = pnand %p422_p5, %p416_p2 }
  0x34   :  { %v366_v9 = vpop.eup %365 }
  0x35   :  { %311 = vmatpush3.bf16.msra.mxu1 %v360_v6  ;;  %331 = vmatpush3.bf16.msra.mxu0 %v360_v6  ;;  %v59_v11 = vmul.f32 0.6931472, %v366_v9 }
  0x36   :  { %312 = vmatprep.subr.bf16.mxu1 %v447_v0  ;;  %332 = vmatprep.subr.bf16.mxu0 %v447_v0 }
  0x37   :  { %v60_v12 = vpack.c.bf16 %v59_v11, %v59_v11 }
  0x39   :  { %313 = vmatpush3.bf16.msra.mxu1 %v361_v7  ;;  %333 = vmatpush3.bf16.msra.mxu0 %v361_v7  ;;  %v61_v14 = vunpack.c.l.bf16 %v60_v12 }
  0x3a   :  { %314 = vmatprep.subr.bf16.mxu1 %v447_v0  ;;  %334 = vmatprep.subr.bf16.mxu0 %v447_v0 }
  0x3b   :  { %v62_v15 = vsub.f32 %v59_v11, %v61_v14 }
  0x3d   :  { %315 = vmatpush3.bf16.msra.mxu1 %v362_v8  ;;  %335 = vmatpush3.bf16.msra.mxu0 %v362_v8  ;;  %v63_v16 = vpack.c.bf16 %v62_v15, %v62_v15 }
  0x3e   :  { %316 = vmatprep.subr.bf16.mxu1 %v447_v0  ;;  %336 = vmatprep.subr.bf16.mxu0 %v447_v0 }
  0x41   :  { %317 = vmatpush3.bf16.msra.mxu1 %v363_v10  ;;  %337 = vmatpush3.bf16.msra.mxu0 %v363_v10 }
  0x42   :  { %318 = vmatprep.subr.bf16.mxu1 %v447_v0  ;;  %338 = vmatprep.subr.bf16.mxu0 %v447_v0 }
  0x45   :  { %319 = vmatpush3.bf16.msra.mxu1 %v364_v13  ;;  %339 = vmatpush3.bf16.msra.mxu0 %v364_v13 }
  0x48   :  { %321 = vmatmul.mubr.bf16.vlgmr.msra.gmra.mrb[0].mxu1 %v63_v16  ;;  %341 = vmatmul.mubr.bf16.vlgmr.msra.gmra.mrb[0].mxu0 %v60_v12 }
 0x11b   :  { %v162_v17 = vpop.f32.mrb[0].mxu1  ;;  %v202_v18 = vpop.f32.mrb[0].mxu0 }
 0x11c   :  { %v203_v19 = vadd.f32 %v202_v18, %v162_v17  ;;  %v322_v20 = vpop.f32.mrb[1].mxu1  ;;  %v342_v21 = vpop.f32.mrb[1].mxu0 }
 0x11d   :  { %v165_v22 = vpop.f32.mrb[2].mxu1  ;;  %v205_v23 = vpop.f32.mrb[2].mxu0 }
 0x11e   :  { %v343_v24 = vpop.f32.mrb[3].mxu0  ;;  %210 = vrot.lane.b32.xlu0 %v203_v19, %s449_s1  ;;  %v323_v25 = vpop.f32.mrb[3].mxu1 }
 0x190   :  { %v211_v28 = vpop.permute.xlu0 %210 }
 0x191   :  { %v213_v29 = vsel %vm212_vm1, %v211_v28, -3e+38 }
 0x192   :  { %v214_v30 = vmax.f32 %v203_v19, %v213_v29 }
 0x194   :  { %215 = vrot.lane.b32.xlu0 %v214_v30, %s450_s6 }
 0x206   :  { %v216_v31 = vpop.permute.xlu0 %215 }
 0x207   :  { %v218_v32 = vsel %vm217_vm2, %v216_v31, -3e+38 }
 0x208   :  { %v219_v33 = vmax.f32 %v214_v30, %v218_v32 }
 0x20a   :  { %220 = vrot.lane.b32.xlu1 %v219_v33, %s446_s3 }
 0x27c   :  { %v221_v34 = vpop.permute.xlu1 %220 }
 0x27d   :  { %v223_v35 = vsel %vm222_vm3, %v221_v34, -3e+38 }
 0x27e   :  { %v224_v36 = vmax.f32 %v219_v33, %v223_v35 }
 0x280   :  { %225 = vrot.lane.b32.xlu1 %v224_v36, %s451_s7 }
 0x2f2   :  { %v226_v37 = vpop.permute.xlu1 %225 }
 0x2f3   :  { %v228_v38 = vsel %vm227_vm4, %v226_v37, -3e+38 }
 0x2f4   :  { %v229_v39 = vmax.f32 %v224_v36, %v228_v38 }
 0x2f6   :  { %230 = vrot.lane.b32.xlu0 %v229_v39, %s452_s8 }
 0x368   :  { %v231_v40 = vpop.permute.xlu0 %230 }
 0x369   :  { %v233_v41 = vsel %vm232_vm5, %v231_v40, -3e+38 }
 0x36a   :  { %v234_v42 = vmax.f32 %v229_v39, %v233_v41 }
 0x36c   :  { %235 = vrot.lane.b32.xlu1 %v234_v42, %s453_s9 }
 0x3de   :  { %v236_v43 = vpop.permute.xlu1 %235 }
 0x3df   :  { %v238_v44 = vsel %vm237_vm6, %v236_v43, -3e+38 }
 0x3e0   :  { %v239_v45 = vmax.f32 %v234_v42, %v238_v44 }
 0x3e2   :  { %240 = vrot.lane.b32.xlu0 %v239_v45, %s445_s0 }
 0x401   :  { %40 = vadd.xlane.f32.xlu0 %v504_v4 }
 0x454   :  { %v241_v46 = vpop.permute.xlu0 %240 }
 0x455   :  { %v243_v47 = vsel %vm242_vm7, %v241_v46, -3e+38 }
 0x456   :  { %v244_v48 = vmax.f32 %v239_v45, %v243_v47 }
 0x458   :  { %v245_v49 = vsub.f32 %v203_v19, %v244_v48 }
 0x45a   :  { %246 = vmin.xlane.f32.xlu1 %v245_v49 }
 0x48e   :  { %v41_v50 = vpop.xlane.xlu0 %40 }
 0x48f   :  { %v42_v51 = vmul.f32 0.0625, %v41_v50 }
 0x491   :  { %v43_v52 = vadd.f32 1.0, %v42_v51 }
 0x493   :  { %v44_v53 = vmul.f32 %v43_v52, %v43_v52 }
 0x495   :  { %v45_v54 = vmul.f32 %v44_v53, %v44_v53 }
 0x497   :  { %v46_v57 = vmul.f32 %v45_v54, %v45_v54 }
 0x499   :  { %v47_v58 = vmul.f32 %v46_v57, %v45_v54  ;;  %v48_v59 = vmul.f32 %v46_v57, %v46_v57 }
 0x49b   :  { %v49_v60 = vmul.f32 %v48_v59, %v47_v58  ;;  %v50_v61 = vmul.f32 %v48_v59, %v48_v59 }
 0x49d   :  { %v51_v0 = vmul.f32 %v50_v61, %v49_v60  ;;  %v52_v1 = vmul.f32 %v50_v61, %v50_v61 }
 0x49f   :  { %v53_v3 = vmul.f32 %v52_v1, %v51_v0  ;;  %v54_v4 = vmul.f32 %v52_v1, %v52_v1 }
 0x4a1   :  { %v55_v5 = vmul.f32 %v54_v4, %v53_v3 }
 0x4a3   :  { %v277_v6 = vadd.f32 -1.0, %v55_v5 }
 0x4e7   :  { %v247_v55 = vpop.xlane.xlu1 %246 }
 0x4e8   :  { %v248_v56 = vmul.f32 1.442695, %v247_v55 }
 0x4ea   :  { %367 = vpow2.f32 %v248_v56 }
 0x4f4   :  { %v368_v62 = vpop.eup %367 }
 0x4f5   :  { %v250_v63 = vsub.f32 1.0, %v368_v62 }
 0x4f7   :  { %v251_v2 = vadd.f32 1e-06, %v250_v63 }
 0x4f9   :  { %369 = vrcp.f32 %v251_v2 }
 0x503   :  { %v370_v7 = vpop.eup %369 }
 0x504   :  { %v253_v8 = vmul.f32 %v370_v7, %v277_v6 }
 0x506   :  { %v254_v9 = vrot.slane %v253_v8, 4 }
 0x508   :  { %v255_v10 = vadd.f32 %v254_v9, %v253_v8 }
 0x50a   :  { %v256_v11 = vrot.slane %v255_v10, 2 }
 0x50c   :  { %v257_v12 = vadd.f32 %v256_v11, %v255_v10 }
 0x50e   :  { %v258_v13 = vrot.slane %v257_v12, 1 }
 0x510   :  { %v259_v14 = vadd.f32 %v258_v13, %v257_v12 }
 0x512   :  { %260 = vst [vmem:[#allocation7] sm:$0x1] %v259_v14 }
 0x513   :  { %426 = shalt.err (!%p423_p6)
}
 0x514   :  { %s427_s16 = scalar_lea.hbm %s524_s2, 16 }
 0x515   :  { %p428_p7 = scmp.ne.s32.totalorder %s524_s2, %s427_s16  ;;  %p431_p8 = scmp.lt.u32.totalorder %s427_s16, %s524_s2 }
 0x517   :  { %p433_p9 = pnand %p431_p8, %p428_p7 }
 0x519   :  { %436 = shalt.err (!%p433_p9)
}
 0x51a   :  { %270 = dma.vmem_to_hbm [thread:$0]  %s268_s11, 16, %s524_s2, [#allocation4]  }
 0x51b   :  { %441 = dma.done.wait [#allocation4], 16  }
 0x51c   :  { %442 = vsyncadd [#allocation4], 4294967280 }
 0x51d   :  { %274 = vsyncpa [#allocation3], 1 }
 0x51e   :  { %275 = vsyncpa [#allocation6], 1 }
 0x51f   :  { %276 = vsyncpa [#allocation4], 1 }

</bundles_post_ra>
